<compile_context>
chip_gen: v7x
topology: tpu7x:2x2x1
jax: 0.10.0
libtpu: 0.0.40
codegen_flags: <defaults>
</compile_context>

<pallas_src>
import functools

import jax
import jax.numpy as jnp
from jax.experimental import pallas as pl
from jax.experimental.pallas import tpu as pltpu


def t2i_final_layer_kernel(x_ref, shift_ref, scale1p_ref, w_ref, b_ref, out_ref):
    """One (batch, token-tile) grid step.  Weight/bias are VMEM-resident.

    x_ref:       (1, TM, D)    token tile (compute dtype, e.g. bf16)
    shift_ref:   (1, 1, D)     per-batch shift  = table[0] + t              (f32)
    scale1p_ref: (1, 1, D)     per-batch 1+scale = 1 + table[1] + t         (f32)
    w_ref:       (Dout, D)     row-permuted weight, resident (compute dtype)
    b_ref:       (Dout, 1)     row-permuted bias, resident                  (f32)
    out_ref:     (1, Dout, TM) transposed output tile
    """
    x = x_ref[0].astype(jnp.float32)                           # (TM, D)
    ms = jnp.mean(x * x, axis=-1, keepdims=True)               # (TM, 1)
    h = x * jax.lax.rsqrt(ms + 1e-6)                           # RMSNorm, no affine
    h = h * scale1p_ref[0] + shift_ref[0]                      # t2i_modulate
    h = h.astype(w_ref.dtype)

    # (Dout, TM) = W_perm (Dout, D) . h (TM, D)^T — contract the D axes so the
    # result is already transposed (lane dim = tokens): unpatchfy becomes a pure
    # reshape in the wrapper instead of a full HBM transpose of (B, N, Dout).
    out = jax.lax.dot_general(
        w_ref[...], h, (((1,), (1,)), ((), ())),
        preferred_element_type=jnp.float32)                    # (Dout, TM), f32 acc
    out_ref[0] = (out + b_ref[...]).astype(out_ref.dtype)


def t2i_final_layer_forward(x, t, params, patch_size=(16, 1), out_channels=256,
                            output_length=None, block_m=256, use_bf16=True,
                            out_dtype=None, vmem_limit_bytes=None):
    """x: (B, N, D) tokens, t: (B, D) conditioning.  Returns (B, C, P, width)."""
    B, N, D = x.shape
    P, Q = patch_size
    C = out_channels
    Dout = P * Q * C
    if output_length is None:
        output_length = N
    if out_dtype is None:
        out_dtype = x.dtype

    table = params["scale_shift_table"].astype(jnp.float32)    # (2, D)
    w = params["w"]                                            # (Dout, D)
    b = params["b"]                                            # (Dout,)
    assert w.shape == (Dout, D) and b.shape == (Dout,)

    compute_dtype = jnp.bfloat16 if use_bf16 else jnp.float32

    # Fold scale_shift_table into per-batch shift / (1+scale) rows (tiny, (B, D)).
    t32 = t.astype(jnp.float32)
    shift = (table[0][None, :] + t32).reshape(B, 1, D)
    scale1p = (1.0 + table[1][None, :] + t32).reshape(B, 1, D)

    # Permute weight rows (and bias) once so the output-feature ordering is
    # (c, p, q) instead of the linear layer's (p, q, c).  The kernel then emits
    # the output in (B, C*P*Q, N) layout and unpatchfy is a cheap reshape.
    # (In production, hoist this permutation out of the step function.)
    w_perm = (w.reshape(P, Q, C, D).transpose(2, 0, 1, 3)
               .reshape(Dout, D).astype(compute_dtype))
    b_perm = (b.reshape(P, Q, C).transpose(2, 0, 1)
               .reshape(Dout, 1).astype(jnp.float32))

    # Token tiling: pad N to a multiple of TM with zeros; padded rows are cropped
    # after the kernel (RMSNorm of a zero row is 0, so no NaNs are produced).
    if N >= block_m:
        TM = block_m                                           # multiple of 128
    else:
        TM = ((N + 7) // 8) * 8
    N_pad = ((N + TM - 1) // TM) * TM
    x_c = x.astype(compute_dtype)                              # halve input HBM read
    if N_pad != N:
        x_c = jnp.pad(x_c, ((0, 0), (0, N_pad - N), (0, 0)))
    grid = (B, N_pad // TM)

    cost = pl.CostEstimate(
        flops=2 * B * N_pad * D * Dout,
        transcendentals=B * N_pad,
        bytes_accessed=(x_c.size * x_c.dtype.itemsize
                        + w_perm.size * w_perm.dtype.itemsize
                        + b_perm.size * 4
                        + 2 * B * D * 4
                        + B * N_pad * Dout * jnp.dtype(out_dtype).itemsize))

    lin_t = pl.pallas_call(
        t2i_final_layer_kernel,
        out_shape=jax.ShapeDtypeStruct((B, Dout, N_pad), out_dtype),
        grid_spec=pltpu.PrefetchScalarGridSpec(
            num_scalar_prefetch=0,
            grid=grid,
            in_specs=[
                pl.BlockSpec((1, TM, D), lambda bi, mi: (bi, mi, 0)),   # x tile
                pl.BlockSpec((1, 1, D), lambda bi, mi: (bi, 0, 0)),     # shift
                pl.BlockSpec((1, 1, D), lambda bi, mi: (bi, 0, 0)),     # 1+scale
                # Constant block index -> DMA'd once, VMEM-resident for all steps.
                pl.BlockSpec((Dout, D), lambda bi, mi: (0, 0)),         # W (resident)
                pl.BlockSpec((Dout, 1), lambda bi, mi: (0, 0)),         # bias (resident)
            ],
            out_specs=pl.BlockSpec((1, Dout, TM), lambda bi, mi: (bi, 0, mi)),
        ),
        compiler_params=pltpu.CompilerParams(
            dimension_semantics=("parallel", "parallel"),
            vmem_limit_bytes=vmem_limit_bytes),
        cost_estimate=cost,
    )(x_c, shift, scale1p, w_perm, b_perm)

    # Fused unpatchfy: only reshape (+ tiny transpose when Q != 1) and pad/crop.
    out = lin_t[:, :, :N]                                      # drop token padding
    out = out.reshape(B, C, P, Q, N)
    if Q != 1:
        out = jnp.transpose(out, (0, 1, 2, 4, 3))              # (B, C, P, N, Q)
    out = out.reshape(B, C, P, N * Q)
    # Reference semantics: compares output_length against new_width == N.
    if output_length > N:
        out = jnp.pad(out, ((0, 0), (0, 0), (0, 0), (0, output_length - N)))
    elif output_length < N:
        out = out[:, :, :, :output_length]
    return out


def _unpatchfy_ref(lin, patch_size, out_channels, output_length):
    """Replicates T2IFinalLayer.unpatchfy exactly (reference path only)."""
    B, N, _ = lin.shape
    P, Q = patch_size
    C = out_channels
    h = lin.reshape(B, 1, N, P, Q, C)                 # n h w p q c
    h = jnp.transpose(h, (0, 5, 1, 3, 2, 4))          # n c h p w q
    out = h.reshape(B, C, 1 * P, N * Q)
    new_width = N
    if output_length > new_width:
        out = jnp.pad(out, ((0, 0), (0, 0), (0, 0), (0, output_length - new_width)))
    elif output_length < new_width:
        out = out[:, :, :, :output_length]
    return out


def reference_forward(x, t, params, patch_size, out_channels, output_length):
    """Pure-JAX f32 reference replicating the PyTorch module."""
    table = params["scale_shift_table"]
    shift = table[0][None, None, :] + t[:, None, :]
    scale = table[1][None, None, :] + t[:, None, :]
    xn = x * jax.lax.rsqrt(jnp.mean(x * x, axis=-1, keepdims=True) + 1e-6)
    xm = xn * (1.0 + scale) + shift
    lin = jnp.einsum("bnd,od->bno", xm, params["w"]) + params["b"]
    return _unpatchfy_ref(lin, patch_size, out_channels, output_length)


if __name__ == "__main__":
    def _run_case(key, B, N, D, patch_size, out_channels, output_length):
        P, Q = patch_size
        Dout = P * Q * out_channels
        kx, kt, ktab, kw, kb = jax.random.split(key, 5)
        x = jax.random.normal(kx, (B, N, D), dtype=jnp.float32)
        t = 0.1 * jax.random.normal(kt, (B, D), dtype=jnp.float32)
        params = {
            "scale_shift_table": jax.random.normal(ktab, (2, D), jnp.float32) / D ** 0.5,
            "w": 0.02 * jax.random.normal(kw, (Dout, D), jnp.float32),
            "b": 0.02 * jax.random.normal(kb, (Dout,), jnp.float32),
        }
        run = jax.jit(functools.partial(
            t2i_final_layer_forward, patch_size=patch_size,
            out_channels=out_channels, output_length=output_length))
        out = jax.block_until_ready(run(x, t, params))
        ref = reference_forward(x, t, params, patch_size, out_channels, output_length)
        assert out.shape == ref.shape, (out.shape, ref.shape)
        max_err = float(jnp.max(jnp.abs(out - ref)))
        # bf16 activations/weights with f32 statistics + accumulation vs f32 ref.
        assert jnp.allclose(out, ref, atol=2e-2, rtol=2e-2), max_err

    key = jax.random.PRNGKey(0)
    k1, k2 = jax.random.split(key)
    # Small config consistent with the module: hidden=128, patch=(16,1), C=8 -> Dout=128.
    _run_case(k1, B=2, N=8, D=128, patch_size=(16, 1), out_channels=8, output_length=8)
    # Ragged token count (exercises N padding) + output_length > N (pad branch).
    _run_case(k2, B=2, N=10, D=128, patch_size=(16, 1), out_channels=8, output_length=13)
    print("KERNEL_OK")
</pallas_src>

<mosaic_0001>
module attributes {stable_mosaic.version = 11 : i64} {
  func.func @t2i_final_layer_kernel(%arg0: i32, %arg1: i32, %arg2: memref<1x8x128xbf16, #tpu.memory_space<vmem>>, %arg3: memref<1x1x128xf32, #tpu.memory_space<vmem>>, %arg4: memref<1x1x128xf32, #tpu.memory_space<vmem>>, %arg5: memref<128x128xbf16, #tpu.memory_space<vmem>>, %arg6: memref<128x1xf32, #tpu.memory_space<vmem>>, %arg7: memref<1x128x8xf32, #tpu.memory_space<vmem>>) attributes {dimension_semantics = [#tpu.dimension_semantics<parallel>, #tpu.dimension_semantics<parallel>], iteration_bounds = array<i64: 2, 1>, scalar_prefetch = 0 : i64, scratch_operands = 0 : i64, tpu.core_type = #tpu.core_type<tc>, window_params = [{transform_indices = @transform_0, window_bounds = array<i64: 1, 8, 128>}, {transform_indices = @transform_1, window_bounds = array<i64: 1, 1, 128>}, {transform_indices = @transform_2, window_bounds = array<i64: 1, 1, 128>}, {pipeline_mode = #tpu.pipeline_mode<synchronous>, transform_indices = @transform_3, window_bounds = array<i64: 128, 128>}, {pipeline_mode = #tpu.pipeline_mode<synchronous>, transform_indices = @transform_4, window_bounds = array<i64: 128, 1>}, {transform_indices = @transform_5, window_bounds = array<i64: 1, 128, 8>}]} {
    %c0 = arith.constant 0 : index
    %c0_0 = arith.constant 0 : index
    %c0_1 = arith.constant 0 : index
    %0 = vector.load %arg2[%c0, %c0_0, %c0_1] : memref<1x8x128xbf16, #tpu.memory_space<vmem>>, vector<1x8x128xbf16>
    %1 = vector.shape_cast %0 : vector<1x8x128xbf16> to vector<8x128xbf16>
    %2 = arith.extf %1 : vector<8x128xbf16> to vector<8x128xf32>
    %3 = arith.mulf %2, %2 : vector<8x128xf32>
    %cst = arith.constant dense<0.000000e+00> : vector<8xf32>
    %4 = vector.multi_reduction <add>, %3, %cst [1] : vector<8x128xf32> to vector<8xf32>
    %5 = vector.shape_cast %4 : vector<8xf32> to vector<8x1xf32>
    %cst_2 = arith.constant 1.280000e+02 : f32
    %6 = vector.broadcast %cst_2 : f32 to vector<8x1xf32>
    %7 = arith.divf %5, %6 : vector<8x1xf32>
    %cst_3 = arith.constant 9.99999997E-7 : f32
    %8 = vector.broadcast %cst_3 : f32 to vector<8x1xf32>
    %9 = arith.addf %7, %8 : vector<8x1xf32>
    %10 = math.rsqrt %9 : vector<8x1xf32>
    %11 = vector.broadcast %10 : vector<8x1xf32> to vector<8x128xf32>
    %12 = arith.mulf %2, %11 : vector<8x128xf32>
    %c0_4 = arith.constant 0 : index
    %c0_5 = arith.constant 0 : index
    %c0_6 = arith.constant 0 : index
    %13 = vector.load %arg4[%c0_4, %c0_5, %c0_6] : memref<1x1x128xf32, #tpu.memory_space<vmem>>, vector<1x1x128xf32>
    %14 = vector.shape_cast %13 : vector<1x1x128xf32> to vector<1x128xf32>
    %15 = vector.broadcast %14 : vector<1x128xf32> to vector<8x128xf32>
    %16 = arith.mulf %12, %15 : vector<8x128xf32>
    %c0_7 = arith.constant 0 : index
    %c0_8 = arith.constant 0 : index
    %c0_9 = arith.constant 0 : index
    %17 = vector.load %arg3[%c0_7, %c0_8, %c0_9] : memref<1x1x128xf32, #tpu.memory_space<vmem>>, vector<1x1x128xf32>
    %18 = vector.shape_cast %17 : vector<1x1x128xf32> to vector<1x128xf32>
    %19 = vector.broadcast %18 : vector<1x128xf32> to vector<8x128xf32>
    %20 = arith.addf %16, %19 : vector<8x128xf32>
    %21 = arith.truncf %20 : vector<8x128xf32> to vector<8x128xbf16>
    %c0_10 = arith.constant 0 : index
    %c0_11 = arith.constant 0 : index
    %22 = vector.load %arg5[%c0_10, %c0_11] : memref<128x128xbf16, #tpu.memory_space<vmem>>, vector<128x128xbf16>
    %cst_12 = arith.constant dense<0.000000e+00> : vector<128x8xf32>
    %23 = tpu.matmul %22, %21, %cst_12 {dimension_numbers = #tpu.dot_dimension_numbers<[1], [1], [0], [0], [0, 0, 1, 0], [], []>} : vector<128x128xbf16>, vector<8x128xbf16>, vector<128x8xf32> -> vector<128x8xf32>
    %c0_13 = arith.constant 0 : index
    %c0_14 = arith.constant 0 : index
    %24 = vector.load %arg6[%c0_13, %c0_14] : memref<128x1xf32, #tpu.memory_space<vmem>>, vector<128x1xf32>
    %25 = vector.broadcast %24 : vector<128x1xf32> to vector<128x8xf32>
    %26 = arith.addf %23, %25 : vector<128x8xf32>
    %c0_15 = arith.constant 0 : index
    %c0_16 = arith.constant 0 : index
    %c0_17 = arith.constant 0 : index
    %27 = vector.load %arg7[%c0_15, %c0_16, %c0_17] : memref<1x128x8xf32, #tpu.memory_space<vmem>>, vector<1x128x8xf32>
    %28 = vector.shape_cast %27 : vector<1x128x8xf32> to vector<128x8xf32>
    %29 = vector.shape_cast %26 : vector<128x8xf32> to vector<1x128x8xf32>
    tpu.vector_store %arg7[%c0_15, %c0_16, %c0_17], %29 {strides = array<i32>} : memref<1x128x8xf32, #tpu.memory_space<vmem>>, vector<1x128x8xf32>,
    return
  }
  func.func @transform_0(%arg0: i32, %arg1: i32) -> (i32, i32, i32) {
    %c0_i32 = arith.constant 0 : i32
    %c0_i32_0 = arith.constant 0 : i32
    return %arg0, %arg1, %c0_i32 : i32, i32, i32
  }
  func.func @transform_1(%arg0: i32, %arg1: i32) -> (i32, i32, i32) {
    %c0_i32 = arith.constant 0 : i32
    %c0_i32_0 = arith.constant 0 : i32
    %c0_i32_1 = arith.constant 0 : i32
    return %arg0, %c0_i32, %c0_i32_0 : i32, i32, i32
  }
  func.func @transform_2(%arg0: i32, %arg1: i32) -> (i32, i32, i32) {
    %c0_i32 = arith.constant 0 : i32
    %c0_i32_0 = arith.constant 0 : i32
    %c0_i32_1 = arith.constant 0 : i32
    return %arg0, %c0_i32, %c0_i32_0 : i32, i32, i32
  }
  func.func @transform_3(%arg0: i32, %arg1: i32) -> (i32, i32) {
    %c0_i32 = arith.constant 0 : i32
    %c0_i32_0 = arith.constant 0 : i32
    %c0_i32_1 = arith.constant 0 : i32
    return %c0_i32, %c0_i32_0 : i32, i32
  }
  func.func @transform_4(%arg0: i32, %arg1: i32) -> (i32, i32) {
    %c0_i32 = arith.constant 0 : i32
    %c0_i32_0 = arith.constant 0 : i32
    %c0_i32_1 = arith.constant 0 : i32
    return %c0_i32, %c0_i32_0 : i32, i32
  }
  func.func @transform_5(%arg0: i32, %arg1: i32) -> (i32, i32, i32) {
    %c0_i32 = arith.constant 0 : i32
    %c0_i32_0 = arith.constant 0 : i32
    return %arg0, %c0_i32, %arg1 : i32, i32, i32
  }
}

</mosaic_0001>

<bundles_post_ra>
// kernel: t2i_final_layer_forward.1
= control target key start
LH: loop header
LB: loop body
LE: loop exit
PB: predicated region body
PF: predicated region fallthrough
CT: control target
= control target key end

     0   :  { %s823_s18 = smov 0   ;;  %s825_s19 = smov 0   ;;  %s974_s0 = inlined_call_operand.vmem [shape: bf16[2,8,128], index: 0, kind: input, shape index: {}]   ;;  %s975_s1 = inlined_call_operand.vmem [shape: f32[2,1,128], index: 1, kind: input, shape index: {}]   ;;  %s976_s2 = inlined_call_operand.vmem [shape: f32[2,1,128], index: 2, kind: input, shape index: {}]   ;;  %s977_s3 = inlined_call_operand.vmem [shape: bf16[128,128], index: 3, kind: input, shape index: {}]   ;;  %s978_s4 = inlined_call_operand.vmem [shape: f32[128,1], index: 4, kind: input, shape index: {}]   ;;  %s979_s5 = inlined_call_operand.vmem [shape: f32[2,128,8], index: 5, kind: output, shape index: {}]  }
   0x1   :  { %s827_s20 = smov 0  }
   0x2 LB: > { %s27_s21 = sadd.s32 1, %s786_s19  ;;  %p685_p0 = scmp.ge.s32.totalorder %s790_s20, 1  ;;  %s790_s20 = sphi %s827_s20, %s15_s20   ;;  %s786_s19 = sphi %s825_s19, %s981_s19   ;;  %s782_s18 = sphi %s823_s18, %s980_s18  }
   0x3   : > { %p29_p1 = scmp.ge.s32.totalorder %s27_s21, 2  ;;  %p221_p2 = scmp.lt.s32.totalorder %s790_s20, 3 }
   0x5   : > { %s983_s21 = smov (%p29_p1, %s27_s21), 0  ;;  %p222_p3 = pnand %p685_p0, %p221_p2 }
   0x6   : > { %p260_p4 = scmp.lt.s32.totalorder (!%p222_p3), %s782_s18, 1  ;;  %v326_v3 = vld [vmem:[%s978_s4 + $0x8] sm:$0xff] (!%p222_p3)  ;;  %v758_v4 = vld [vmem:[%s977_s3] sm:$0xff] (!%p222_p3)   ;;  %v792_v6 = vmov (!%p222_p3), 0   ;;  %v327_v7 = vld [vmem:[%s978_s4 + $0x10] sm:$0xff] (!%p222_p3)  ;;  %vm566_vm0 = vcmask (!%p222_p3), 64512  }
   0x7   : > { %225 = sbr.rel (%p222_p3) target bundleno = 421 (0x1a5), region = 40  ;;  %v759_v5 = vld [vmem:[%s977_s3 + $0x20] sm:$0xff] (!%p222_p3)   ;;  %757 = vset.pattern.permute.xlu1 (!%p222_p3), %v792_v6  ;;  %756 = vset.pattern.permute.xlu0 (!%p222_p3), %v792_v6  ;;  %v328_v8 = vld [vmem:[%s978_s4 + $0x18] sm:$0xff] (!%p222_p3)  ;;  %v330_v10 = vld [vmem:[%s978_s4 + $0x28] sm:$0xff] (!%p222_p3) }
   0x8   : > { %348 = vperm.xlu1 (!%p222_p3), %757, %v326_v3   ;;  %713 = vmatprep.mubr.bf16.mxu0 (!%p222_p3), %v758_v4  ;;  %v329_v9 = vld [vmem:[%s978_s4 + $0x20] sm:$0xff] (!%p222_p3)  ;;  %v338_v12 = vld [vmem:[%s978_s4 + $0x68] sm:$0xff] (!%p222_p3)  ;;  %v331_v13 = vld [vmem:[%s978_s4 + $0x30] sm:$0xff] (!%p222_p3) }
   0x9   : > { %721 = vmatprep.mubr.bf16.mxu1 (!%p222_p3), %v759_v5  ;;  %v325_v11 = vld [vmem:[%s978_s4] sm:$0xff] (!%p222_p3)  ;;  %v340_v14 = vld [vmem:[%s978_s4 + $0x78] sm:$0xff] (!%p222_p3)  ;;  %v334_v17 = vld [vmem:[%s978_s4 + $0x48] sm:$0xff] (!%p222_p3) }
   0xa   : > { %v332_v15 = vld [vmem:[%s978_s4 + $0x38] sm:$0xff] (!%p222_p3)  ;;  %v333_v16 = vld [vmem:[%s978_s4 + $0x40] sm:$0xff] (!%p222_p3)  ;;  %v335_v18 = vld [vmem:[%s978_s4 + $0x50] sm:$0xff] (!%p222_p3) }
   0xb   : > { %v336_v19 = vld [vmem:[%s978_s4 + $0x58] sm:$0xff] (!%p222_p3)  ;;  %v337_v20 = vld [vmem:[%s978_s4 + $0x60] sm:$0xff] (!%p222_p3)  ;;  %v339_v21 = vld [vmem:[%s978_s4 + $0x70] sm:$0xff] (!%p222_p3) }
   0xc   : > { %353 = vperm.xlu1 (!%p222_p3), %757, %v327_v7   ;;  %v760_v32 = vld [vmem:[%s977_s3 + $0x8] sm:$0xff] (!%p222_p3)   ;;  %v762_v34 = vld [vmem:[%s977_s3 + $0x10] sm:$0xff] (!%p222_p3)   ;;  %v764_v36 = vld [vmem:[%s977_s3 + $0x18] sm:$0xff] (!%p222_p3)  }
   0xd   : > { %v761_v33 = vld [vmem:[%s977_s3 + $0x28] sm:$0xff] (!%p222_p3)   ;;  %v763_v35 = vld [vmem:[%s977_s3 + $0x30] sm:$0xff] (!%p222_p3)   ;;  %v765_v37 = vld [vmem:[%s977_s3 + $0x38] sm:$0xff] (!%p222_p3)  }
   0xe   : > { %s985_s18 = smov (!%p260_p4, %s782_s18), 1 }
   0xf   : > { %s686_s22 = sshll.u32 %s985_s18, 2  ;;  %s701_s13 = sshll.u32 %s985_s18, 7 }
  0x10   : > { %s266_s25 = scalar_lea.vmem %s974_s0, %s686_s22  ;;  %358 = vperm.xlu1 %757, %v328_v8   ;;  %s272_s22 = scalar_lea.vmem %s976_s2, %s985_s18 }
  0x11   : > { %v282_v0 = vld [vmem:[%s266_s25] sm:$0xf]  ;;  %s269_s25 = scalar_lea.vmem %s975_s1, %s985_s18  ;;  %s931_s16 = scalar_lea.vmem %s979_s5, %s701_s13 }
  0x12   : > { %v283_v1 = vunpack.c.l.bf16 %v282_v0  ;;  %v689_v26 = vld [vmem:[%s272_s22] ss:$0 sm:$0xff] }
  0x13   : > { %v690_v28 = vld [vmem:[%s269_s25] ss:$0 sm:$0xff] }
  0x14   : > { %v284_v2 = vmul.f32 %v283_v1, %v283_v1  ;;  %363 = vperm.xlu1 %757, %v329_v9  }
  0x16   : > { %285 = vadd.xlane.f32.xlu0 %v284_v2 }
  0x18   : > { %368 = vperm.xlu1 %757, %v330_v10  }
  0x1c   : > { %373 = vperm.xlu1 %757, %v331_v13  }
  0x20   : > { %378 = vperm.xlu1 %757, %v332_v15  }
  0x24   : > { %383 = vperm.xlu1 %757, %v333_v16  }
  0x28   : > { %388 = vperm.xlu1 %757, %v334_v17  }
  0x2c   : > { %343 = vperm.xlu0 %756, %v325_v11   ;;  %393 = vperm.xlu1 %757, %v335_v18  }
  0x30   : > { %408 = vperm.xlu0 %756, %v338_v12   ;;  %398 = vperm.xlu1 %757, %v336_v19  }
  0x34   : > { %418 = vperm.xlu0 %756, %v340_v14   ;;  %403 = vperm.xlu1 %757, %v337_v20  }
  0x38   : > { %413 = vperm.xlu1 %757, %v339_v21  }
  0x87   : > { %v349_v38 = vpop.permute.xlu1 %348 }
  0x8b   : > { %v354_v39 = vpop.permute.xlu1 %353 }
  0x8f   : > { %v359_v40 = vpop.permute.xlu1 %358 }
  0x93   : > { %v364_v41 = vpop.permute.xlu1 %363 }
  0x97   : > { %v369_v42 = vpop.permute.xlu1 %368 }
  0x9b   : > { %v374_v43 = vpop.permute.xlu1 %373 }
  0x9f   : > { %v379_v44 = vpop.permute.xlu1 %378 }
  0xa3   : > { %v286_v22 = vpop.xlane.xlu0 %285  ;;  %v384_v45 = vpop.permute.xlu1 %383 }
  0xa4   : > { %v288_v23 = vmul.f32 0.0078125, %v286_v22 }
  0xa6   : > { %v289_v24 = vadd.f32 1e-06, %v288_v23 }
  0xa7   : > { %v389_v46 = vpop.permute.xlu1 %388 }
  0xa8   : > { %766 = vrsqrt.f32 %v289_v24 }
  0xab   : > { %v394_v47 = vpop.permute.xlu1 %393  ;;  %v344_v49 = vpop.permute.xlu0 %343 }
  0xaf   : > { %v399_v48 = vpop.permute.xlu1 %398  ;;  %v409_v51 = vpop.permute.xlu0 %408 }
  0xb2   : > { %v767_v25 = vpop.eup %766 }
  0xb3   : > { %v291_v27 = vmul.f32 %v767_v25, %v283_v1  ;;  %v404_v50 = vpop.permute.xlu1 %403  ;;  %v419_v5 = vpop.permute.xlu0 %418 }
  0xb5   : > { %v299_v29 = vmul.f32 %v689_v26, %v291_v27 }
  0xb7   : > { %v307_v30 = vadd.f32 %v690_v28, %v299_v29  ;;  %v414_v4 = vpop.permute.xlu1 %413 }
  0xb9   : > { %v308_v31 = vpack.c.bf16 %v307_v30, %v307_v30 }
  0xbb   : > { %711 = vmatprep.subr.bf16.mxu0 %v308_v31  ;;  %729 = vmatprep.subr.bf16.mxu1 %v308_v31 }
  0xbc   : > { %712 = vmatpush3.bf16.xpose.msra.mxu0 %v308_v31  ;;  %730 = vmatpush3.bf16.xpose.msra.mxu1 %v308_v31 }
  0xc3   : > { %714 = vmatmul.mubr.bf16.vlgmr.msra.gmra.mrb[0].mxu0 %v760_v32  ;;  %722 = vmatmul.mubr.bf16.vlgmr.msra.gmra.mrb[0].mxu1 %v761_v33 }
  0xc4   : > { %717 = vmatprep.mubr.bf16.mxu0 %v762_v34  ;;  %725 = vmatprep.mubr.bf16.mxu1 %v763_v35 }
  0xcb   : > { %718 = vmatmul.mubr.bf16.gmra.mrb[4].mxu0 %v764_v36  ;;  %726 = vmatmul.mubr.bf16.gmra.mrb[4].mxu1 %v765_v37 }
 0x196   : > { %v715_v52 = vpop.f32.mrb[0].mxu0  ;;  %v723_v53 = vpop.f32.mrb[0].mxu1 }
 0x197   : > { %v512_v54 = vadd.f32 %v715_v52, %v354_v39  ;;  %v544_v55 = vadd.f32 %v723_v53, %v394_v47  ;;  %v503_v56 = vpop.f32.mrb[1].mxu0  ;;  %v535_v57 = vpop.f32.mrb[1].mxu1 }
 0x198   : > { %v504_v58 = vadd.f32 %v503_v56, %v344_v49  ;;  %v536_v59 = vadd.f32 %v535_v57, %v384_v45  ;;  %v716_v60 = vpop.f32.mrb[2].mxu0  ;;  %v724_v61 = vpop.f32.mrb[2].mxu1 }
 0x199   : > { %569 = vst.msk [vmem:[%s931_s16 + $0x10] sm:$0xff] %vm566_vm0, %v512_v54  ;;  %577 = vst.msk [vmem:[%s931_s16 + $0x50] sm:$0xff] %vm566_vm0, %v544_v55  ;;  %v515_v62 = vadd.f32 %v716_v60, %v359_v40  ;;  %v547_v63 = vadd.f32 %v724_v61, %v399_v48  ;;  %v506_v0 = vpop.f32.mrb[3].mxu0  ;;  %v538_v1 = vpop.f32.mrb[3].mxu1 }
 0x19a   : > { %567 = vst.msk [vmem:[%s931_s16] sm:$0xff] %vm566_vm0, %v504_v58  ;;  %575 = vst.msk [vmem:[%s931_s16 + $0x40] sm:$0xff] %vm566_vm0, %v536_v59  ;;  %v507_v2 = vadd.f32 %v506_v0, %v349_v38  ;;  %v539_v3 = vadd.f32 %v538_v1, %v389_v46 }
 0x19b   : > { %570 = vst.msk [vmem:[%s931_s16 + $0x18] sm:$0xff] %vm566_vm0, %v515_v62  ;;  %578 = vst.msk [vmem:[%s931_s16 + $0x58] sm:$0xff] %vm566_vm0, %v547_v63 }
 0x19c   : > { %568 = vst.msk [vmem:[%s931_s16 + $0x8] sm:$0xff] %vm566_vm0, %v507_v2  ;;  %576 = vst.msk [vmem:[%s931_s16 + $0x48] sm:$0xff] %vm566_vm0, %v539_v3 }
 0x19e   : > { %v719_v6 = vpop.f32.mrb[4].mxu0  ;;  %v727_v7 = vpop.f32.mrb[4].mxu1 }
 0x19f   : > { %v528_v8 = vadd.f32 %v719_v6, %v374_v43  ;;  %v560_v9 = vadd.f32 %v727_v7, %v414_v4  ;;  %v519_v10 = vpop.f32.mrb[5].mxu0  ;;  %v551_v11 = vpop.f32.mrb[5].mxu1 }
 0x1a0   : > { %v520_v12 = vadd.f32 %v519_v10, %v364_v41  ;;  %v552_v13 = vadd.f32 %v551_v11, %v404_v50  ;;  %v720_v14 = vpop.f32.mrb[6].mxu0  ;;  %v728_v15 = vpop.f32.mrb[6].mxu1 }
 0x1a1   : > { %573 = vst.msk [vmem:[%s931_s16 + $0x30] sm:$0xff] %vm566_vm0, %v528_v8  ;;  %581 = vst.msk [vmem:[%s931_s16 + $0x70] sm:$0xff] %vm566_vm0, %v560_v9  ;;  %v531_v16 = vadd.f32 %v720_v14, %v379_v44  ;;  %v563_v17 = vadd.f32 %v728_v15, %v419_v5  ;;  %v522_v18 = vpop.f32.mrb[7].mxu0  ;;  %v554_v19 = vpop.f32.mrb[7].mxu1 }
 0x1a2   : > { %571 = vst.msk [vmem:[%s931_s16 + $0x20] sm:$0xff] %vm566_vm0, %v520_v12  ;;  %579 = vst.msk [vmem:[%s931_s16 + $0x60] sm:$0xff] %vm566_vm0, %v552_v13  ;;  %v523_v20 = vadd.f32 %v522_v18, %v369_v42  ;;  %v555_v21 = vadd.f32 %v554_v19, %v409_v51 }
 0x1a3   : > { %574 = vst.msk [vmem:[%s931_s16 + $0x38] sm:$0xff] %vm566_vm0, %v531_v16  ;;  %582 = vst.msk [vmem:[%s931_s16 + $0x78] sm:$0xff] %vm566_vm0, %v563_v17 }
 0x1a4   : > { %572 = vst.msk [vmem:[%s931_s16 + $0x28] sm:$0xff] %vm566_vm0, %v523_v20  ;;  %580 = vst.msk [vmem:[%s931_s16 + $0x68] sm:$0xff] %vm566_vm0, %v555_v21 }
 0x1a5 PF: > { %s15_s20 = sadd.s32 1, %s790_s20   ;;  %s980_s18 = smov %s786_s19 }
 0x1a6   : > { %p12_p5 = scmp.ge.s32.totalorder %s15_s20, 4   ;;  %s981_s19 = smov %s983_s21 }
 0x1a8   :  { %14 = sbr.rel (!%p12_p5) target bundleno = 2 (0x2), region = 76 }

</bundles_post_ra>
